<compile_context>
chip_gen: v7x
topology: tpu7x:2x2x1
jax: 0.10.0
libtpu: 0.0.40
codegen_flags: <defaults>
</compile_context>

<pallas_src>
import functools

import jax
import jax.numpy as jnp
from jax.experimental import pallas as pl
from jax.experimental.pallas import tpu as pltpu


def _round_up(x, m):
    return ((x + m - 1) // m) * m


def actor_kernel(split,
                 state_ref,
                 w1_ref, b1_ref,
                 w2_ref, b2_ref,
                 wh_ref, bh_ref,
                 out_ref):
    # fc1 + relu (bf16 operands, f32 accumulate / elementwise)
    x = state_ref[...]
    h1 = jnp.dot(x, w1_ref[...], preferred_element_type=jnp.float32) + b1_ref[...]
    h1 = jnp.maximum(h1, 0.0)

    # fc2 + relu
    h2 = jnp.dot(h1.astype(jnp.bfloat16), w2_ref[...],
                 preferred_element_type=jnp.float32) + b2_ref[...]
    h2 = jnp.maximum(h2, 0.0)

    # fused heads: lanes [0, split) -> mean, lanes [split, ...) -> log_std
    head = jnp.dot(h2.astype(jnp.bfloat16), wh_ref[...],
                   preferred_element_type=jnp.float32) + bh_ref[...]

    lane = jax.lax.broadcasted_iota(jnp.int32, head.shape, 1)
    out_ref[...] = jnp.where(lane < split, head, jnp.exp(head)).astype(out_ref.dtype)


def actor_forward(state, params, *, block_b=1024):
    """state: [B, state_dim] float32. params: dict of [in,out] weights + biases.

    Returns (mean, std), each [B, action_dim] float32.
    """
    B, state_dim = state.shape
    H = params["w1"].shape[1]
    A = params["wm"].shape[1]

    # Padded, (8,128)-friendly dims.
    S_pad = _round_up(state_dim, 128)
    H_pad = _round_up(H, 128)
    N_pad = _round_up(2 * A, 128)          # lane-dense fused head output

    TB = min(_round_up(B, 8), block_b)     # batch tile (rows per grid step)
    B_pad = _round_up(B, TB)

    # --- pad + cast inputs/weights (zeros contribute nothing to the matmuls) ---
    state_p = jnp.zeros((B_pad, S_pad), jnp.float32).at[:B, :state_dim].set(state)
    state_bf = state_p.astype(jnp.bfloat16)

    w1 = (jnp.zeros((S_pad, H_pad), jnp.float32)
          .at[:state_dim, :H].set(params["w1"])).astype(jnp.bfloat16)
    b1 = jnp.zeros((1, H_pad), jnp.float32).at[0, :H].set(params["b1"])

    w2 = (jnp.zeros((H_pad, H_pad), jnp.float32)
          .at[:H, :H].set(params["w2"])).astype(jnp.bfloat16)
    b2 = jnp.zeros((1, H_pad), jnp.float32).at[0, :H].set(params["b2"])

    # Fused head weight: [:, :A] = mean head, [:, A:2A] = log_std head.
    w_head = (jnp.zeros((H_pad, N_pad), jnp.float32)
              .at[:H, :A].set(params["wm"])
              .at[:H, A:2 * A].set(params["ws"])).astype(jnp.bfloat16)
    b_head = (jnp.zeros((1, N_pad), jnp.float32)
              .at[0, :A].set(params["bm"])
              .at[0, A:2 * A].set(params["bs"]))

    grid = (B_pad // TB,)

    # Weights/biases: full-array blocks with constant index_maps -> VMEM-resident.
    const2d = lambda arr: pl.BlockSpec(arr.shape, lambda i: (0, 0))

    flops = 2 * B_pad * (S_pad * H_pad + H_pad * H_pad + H_pad * N_pad)
    bytes_accessed = (B_pad * S_pad * 2                       # state (bf16)
                      + (S_pad * H_pad + H_pad * H_pad + H_pad * N_pad) * 2  # weights
                      + (2 * H_pad + N_pad) * 4               # biases (f32)
                      + B_pad * N_pad * 4)                    # output (f32)

    out = pl.pallas_call(
        functools.partial(actor_kernel, A),
        out_shape=jax.ShapeDtypeStruct((B_pad, N_pad), jnp.float32),
        grid=grid,
        in_specs=[
            pl.BlockSpec((TB, S_pad), lambda i: (i, 0)),   # state tile over batch
            const2d(w1), const2d(b1),
            const2d(w2), const2d(b2),
            const2d(w_head), const2d(b_head),
        ],
        out_specs=pl.BlockSpec((TB, N_pad), lambda i: (i, 0)),
        compiler_params=pltpu.CompilerParams(
            dimension_semantics=("parallel",)),
        cost_estimate=pl.CostEstimate(
            flops=flops,
            transcendentals=B_pad * N_pad,
            bytes_accessed=bytes_accessed),
    )(state_bf, w1, b1, w2, b2, w_head, b_head)

    mean = out[:B, :A]
    std = out[:B, A:2 * A]
    return mean, std


def xavier_uniform(key, fan_in, fan_out):
    # matches torch.nn.init.xavier_uniform_ (gain=1): U(-a, a), a = sqrt(6/(fan_in+fan_out))
    a = (6.0 / (fan_in + fan_out)) ** 0.5
    # PyTorch weight is (out, in); we store the transpose (in, out) for x @ W.
    w_pt = jax.random.uniform(key, (fan_out, fan_in), jnp.float32, -a, a)
    return w_pt.T


def init_actor_params(key, state_dim, action_dim, hidden_size=256):
    k1, k2, k3, k4 = jax.random.split(key, 4)
    return {
        "w1": xavier_uniform(k1, state_dim, hidden_size),
        "b1": jnp.zeros((hidden_size,), jnp.float32),
        "w2": xavier_uniform(k2, hidden_size, hidden_size),
        "b2": jnp.zeros((hidden_size,), jnp.float32),
        "wm": xavier_uniform(k3, hidden_size, action_dim),
        "bm": jnp.zeros((action_dim,), jnp.float32),
        "ws": xavier_uniform(k4, hidden_size, action_dim),
        "bs": jnp.zeros((action_dim,), jnp.float32),
    }


def actor_forward_ref(state, p):
    h1 = jnp.maximum(state @ p["w1"] + p["b1"], 0.0)
    h2 = jnp.maximum(h1 @ p["w2"] + p["b2"], 0.0)
    mean = h2 @ p["wm"] + p["bm"]
    std = jnp.exp(h2 @ p["ws"] + p["bs"])
    return mean, std


if __name__ == "__main__":
    key = jax.random.PRNGKey(0)
    k_params, k_state = jax.random.split(key)

    batch = 8
    state_dim = 16
    action_dim = 8
    hidden = 32

    params = init_actor_params(k_params, state_dim, action_dim, hidden_size=hidden)
    state = jax.random.normal(k_state, (batch, state_dim), jnp.float32)

    mean, std = actor_forward(state, params)
    mean = jax.block_until_ready(mean)
    std = jax.block_until_ready(std)

    # f32 reference; bf16 matmul operands with f32 accumulation -> loose tolerance.
    mean_ref, std_ref = actor_forward_ref(state, params)
    assert mean.shape == (batch, action_dim) and std.shape == (batch, action_dim)
    assert jnp.allclose(mean, mean_ref, atol=2e-2, rtol=2e-2), (
        float(jnp.max(jnp.abs(mean - mean_ref))))
    assert jnp.allclose(std, std_ref, atol=2e-2, rtol=2e-2), (
        float(jnp.max(jnp.abs(std - std_ref))))
    assert bool(jnp.all(std > 0))

    print("KERNEL_OK")
</pallas_src>

<mosaic_0001>
module attributes {stable_mosaic.version = 11 : i64} {
  func.func @actor_kernel(%arg0: i32, %arg1: memref<8x128xbf16, #tpu.memory_space<vmem>>, %arg2: memref<128x128xbf16, #tpu.memory_space<vmem>>, %arg3: memref<1x128xf32, #tpu.memory_space<vmem>>, %arg4: memref<128x128xbf16, #tpu.memory_space<vmem>>, %arg5: memref<1x128xf32, #tpu.memory_space<vmem>>, %arg6: memref<128x128xbf16, #tpu.memory_space<vmem>>, %arg7: memref<1x128xf32, #tpu.memory_space<vmem>>, %arg8: memref<8x128xf32, #tpu.memory_space<vmem>>) attributes {dimension_semantics = [#tpu.dimension_semantics<parallel>], iteration_bounds = array<i64: 1>, scalar_prefetch = 0 : i64, scratch_operands = 0 : i64, tpu.core_type = #tpu.core_type<tc>, window_params = [{transform_indices = @transform_0, window_bounds = array<i64: 8, 128>}, {pipeline_mode = #tpu.pipeline_mode<synchronous>, transform_indices = @transform_1, window_bounds = array<i64: 128, 128>}, {pipeline_mode = #tpu.pipeline_mode<synchronous>, transform_indices = @transform_2, window_bounds = array<i64: 1, 128>}, {pipeline_mode = #tpu.pipeline_mode<synchronous>, transform_indices = @transform_3, window_bounds = array<i64: 128, 128>}, {pipeline_mode = #tpu.pipeline_mode<synchronous>, transform_indices = @transform_4, window_bounds = array<i64: 1, 128>}, {pipeline_mode = #tpu.pipeline_mode<synchronous>, transform_indices = @transform_5, window_bounds = array<i64: 128, 128>}, {pipeline_mode = #tpu.pipeline_mode<synchronous>, transform_indices = @transform_6, window_bounds = array<i64: 1, 128>}, {transform_indices = @transform_7, window_bounds = array<i64: 8, 128>}]} {
    %c0 = arith.constant 0 : index
    %c0_0 = arith.constant 0 : index
    %0 = vector.load %arg1[%c0, %c0_0] : memref<8x128xbf16, #tpu.memory_space<vmem>>, vector<8x128xbf16>
    %c0_1 = arith.constant 0 : index
    %c0_2 = arith.constant 0 : index
    %1 = vector.load %arg2[%c0_1, %c0_2] : memref<128x128xbf16, #tpu.memory_space<vmem>>, vector<128x128xbf16>
    %cst = arith.constant dense<0.000000e+00> : vector<8x128xf32>
    %2 = tpu.matmul %0, %1, %cst {dimension_numbers = #tpu.dot_dimension_numbers<[1], [0], [0], [1], [0, 0, 1, 1], [], []>} : vector<8x128xbf16>, vector<128x128xbf16>, vector<8x128xf32> -> vector<8x128xf32>
    %c0_3 = arith.constant 0 : index
    %c0_4 = arith.constant 0 : index
    %3 = vector.load %arg3[%c0_3, %c0_4] : memref<1x128xf32, #tpu.memory_space<vmem>>, vector<1x128xf32>
    %4 = vector.broadcast %3 : vector<1x128xf32> to vector<8x128xf32>
    %5 = arith.addf %2, %4 : vector<8x128xf32>
    %cst_5 = arith.constant 0.000000e+00 : f32
    %6 = vector.broadcast %cst_5 : f32 to vector<8x128xf32>
    %7 = arith.maximumf %5, %6 : vector<8x128xf32>
    %8 = arith.truncf %7 : vector<8x128xf32> to vector<8x128xbf16>
    %c0_6 = arith.constant 0 : index
    %c0_7 = arith.constant 0 : index
    %9 = vector.load %arg4[%c0_6, %c0_7] : memref<128x128xbf16, #tpu.memory_space<vmem>>, vector<128x128xbf16>
    %cst_8 = arith.constant dense<0.000000e+00> : vector<8x128xf32>
    %10 = tpu.matmul %8, %9, %cst_8 {dimension_numbers = #tpu.dot_dimension_numbers<[1], [0], [0], [1], [0, 0, 1, 1], [], []>} : vector<8x128xbf16>, vector<128x128xbf16>, vector<8x128xf32> -> vector<8x128xf32>
    %c0_9 = arith.constant 0 : index
    %c0_10 = arith.constant 0 : index
    %11 = vector.load %arg5[%c0_9, %c0_10] : memref<1x128xf32, #tpu.memory_space<vmem>>, vector<1x128xf32>
    %12 = vector.broadcast %11 : vector<1x128xf32> to vector<8x128xf32>
    %13 = arith.addf %10, %12 : vector<8x128xf32>
    %cst_11 = arith.constant 0.000000e+00 : f32
    %14 = vector.broadcast %cst_11 : f32 to vector<8x128xf32>
    %15 = arith.maximumf %13, %14 : vector<8x128xf32>
    %16 = arith.truncf %15 : vector<8x128xf32> to vector<8x128xbf16>
    %c0_12 = arith.constant 0 : index
    %c0_13 = arith.constant 0 : index
    %17 = vector.load %arg6[%c0_12, %c0_13] : memref<128x128xbf16, #tpu.memory_space<vmem>>, vector<128x128xbf16>
    %cst_14 = arith.constant dense<0.000000e+00> : vector<8x128xf32>
    %18 = tpu.matmul %16, %17, %cst_14 {dimension_numbers = #tpu.dot_dimension_numbers<[1], [0], [0], [1], [0, 0, 1, 1], [], []>} : vector<8x128xbf16>, vector<128x128xbf16>, vector<8x128xf32> -> vector<8x128xf32>
    %c0_15 = arith.constant 0 : index
    %c0_16 = arith.constant 0 : index
    %19 = vector.load %arg7[%c0_15, %c0_16] : memref<1x128xf32, #tpu.memory_space<vmem>>, vector<1x128xf32>
    %20 = vector.broadcast %19 : vector<1x128xf32> to vector<8x128xf32>
    %21 = arith.addf %18, %20 : vector<8x128xf32>
    %22 = tpu.iota {dimensions = array<i32: 1>} : vector<8x128xi32>
    %c8_i32 = arith.constant 8 : i32
    %23 = vector.broadcast %c8_i32 : i32 to vector<8x128xi32>
    %24 = arith.cmpi slt, %22, %23 : vector<8x128xi32>
    %25 = math.exp %21 : vector<8x128xf32>
    %26 = arith.select %24, %21, %25 : vector<8x128xi1>, vector<8x128xf32>
    %c0_17 = arith.constant 0 : index
    %c0_18 = arith.constant 0 : index
    %27 = vector.load %arg8[%c0_17, %c0_18] : memref<8x128xf32, #tpu.memory_space<vmem>>, vector<8x128xf32>
    tpu.vector_store %arg8[%c0_17, %c0_18], %26 {strides = array<i32>} : memref<8x128xf32, #tpu.memory_space<vmem>>, vector<8x128xf32>,
    return
  }
  func.func @transform_0(%arg0: i32) -> (i32, i32) {
    %c0_i32 = arith.constant 0 : i32
    %c0_i32_0 = arith.constant 0 : i32
    return %arg0, %c0_i32 : i32, i32
  }
  func.func @transform_1(%arg0: i32) -> (i32, i32) {
    %c0_i32 = arith.constant 0 : i32
    %c0_i32_0 = arith.constant 0 : i32
    %c0_i32_1 = arith.constant 0 : i32
    return %c0_i32, %c0_i32_0 : i32, i32
  }
  func.func @transform_2(%arg0: i32) -> (i32, i32) {
    %c0_i32 = arith.constant 0 : i32
    %c0_i32_0 = arith.constant 0 : i32
    %c0_i32_1 = arith.constant 0 : i32
    return %c0_i32, %c0_i32_0 : i32, i32
  }
  func.func @transform_3(%arg0: i32) -> (i32, i32) {
    %c0_i32 = arith.constant 0 : i32
    %c0_i32_0 = arith.constant 0 : i32
    %c0_i32_1 = arith.constant 0 : i32
    return %c0_i32, %c0_i32_0 : i32, i32
  }
  func.func @transform_4(%arg0: i32) -> (i32, i32) {
    %c0_i32 = arith.constant 0 : i32
    %c0_i32_0 = arith.constant 0 : i32
    %c0_i32_1 = arith.constant 0 : i32
    return %c0_i32, %c0_i32_0 : i32, i32
  }
  func.func @transform_5(%arg0: i32) -> (i32, i32) {
    %c0_i32 = arith.constant 0 : i32
    %c0_i32_0 = arith.constant 0 : i32
    %c0_i32_1 = arith.constant 0 : i32
    return %c0_i32, %c0_i32_0 : i32, i32
  }
  func.func @transform_6(%arg0: i32) -> (i32, i32) {
    %c0_i32 = arith.constant 0 : i32
    %c0_i32_0 = arith.constant 0 : i32
    %c0_i32_1 = arith.constant 0 : i32
    return %c0_i32, %c0_i32_0 : i32, i32
  }
  func.func @transform_7(%arg0: i32) -> (i32, i32) {
    %c0_i32 = arith.constant 0 : i32
    %c0_i32_0 = arith.constant 0 : i32
    return %arg0, %c0_i32 : i32, i32
  }
}

</mosaic_0001>

<bundles_post_ra>
// kernel: tpu_custom_call.1
= control target key start
LH: loop header
LB: loop body
LE: loop exit
PB: predicated region body
PF: predicated region fallthrough
CT: control target
= control target key end

     0   :  { %12 = vsyncpa [#allocation3], 0  ;;  %s867_s0 = inlined_call_operand.hbm [shape: bf16[8,128], index: 0, kind: input, shape index: {}]   ;;  %s868_s1 = inlined_call_operand.hbm [shape: bf16[128,128], index: 1, kind: input, shape index: {}]   ;;  %s869_s2 = inlined_call_operand.vmem [shape: f32[1,128], index: 2, kind: input, shape index: {}]   ;;  %s870_s3 = inlined_call_operand.hbm [shape: bf16[128,128], index: 3, kind: input, shape index: {}]   ;;  %s871_s4 = inlined_call_operand.vmem [shape: f32[1,128], index: 4, kind: input, shape index: {}]   ;;  %s872_s5 = inlined_call_operand.hbm [shape: bf16[128,128], index: 5, kind: input, shape index: {}]   ;;  %s873_s6 = inlined_call_operand.vmem [shape: f32[1,128], index: 6, kind: input, shape index: {}]   ;;  %s874_s7 = inlined_call_operand.hbm [shape: f32[8,128], index: 7, kind: output, shape index: {}]  }
   0x1   :  { %13 = vsyncpa [#allocation6], 0 }
   0x2   :  { %14 = vsyncpa [#allocation9], 0 }
   0x3   :  { %15 = vsyncpa [#allocation4], 0  ;;  %s710_s24 = smov [#allocation5]   ;;  %s592_s28 = scalar_lea.hbm %s868_s1, 1024 }
   0x4   :  { %s31_s25 = sshll.u32 %s710_s24, 4  ;;  %p593_p0 = scmp.ne.s32.totalorder %s868_s1, %s592_s28  ;;  %s32_s25 = int_to_ptr.vmem [resolvable:$true] %s31_s25 }
   0x5   :  { %p596_p1 = scmp.lt.u32.totalorder %s592_s28, %s868_s1 }
   0x7   :  { %p598_p2 = pnand %p596_p1, %p593_p0 }
   0x9   :  { %601 = shalt.err (!%p598_p2)
}
   0xa   :  { %s602_s10 = scalar_lea.vmem %s32_s25, 1024  ;;  %p607_p4 = scmp.lt.s32.totalorder %s32_s25, %s32_s25 }
   0xb   :  { %p603_p3 = scmp.ne.s32.totalorder %s32_s25, %s602_s10  ;;  %p608_p5 = scmp.lt.s32.totalorder %s602_s10, %s602_s10 }
   0xd   :  { %p609_p6 = por %p608_p5, %p607_p4 }
   0xf   :  { %p610_p7 = pnand %p609_p6, %p603_p3 }
  0x11   :  { %613 = shalt.err (!%p610_p7)
}
  0x12   :  { %s711_s11 = smov 64   ;;  %s712_s12 = smov 4  }
  0x13   :  { %37 = dma.hbm_to_vmem [thread:$0]  %s868_s1, 1024, %s32_s25, [#allocation6], %s711_s11, %s711_s11, %s712_s12  }
  0x14   :  { %s713_s15 = smov [#allocation2]   ;;  %s714_s17 = smov [#allocation7]  }
  0x15   :  { %s22_s16 = sshll.u32 %s713_s15, 4  ;;  %s45_s18 = sshll.u32 %s714_s17, 4  ;;  %s23_s16 = int_to_ptr.vmem [resolvable:$true] %s22_s16  ;;  %s46_s18 = int_to_ptr.vmem [resolvable:$true] %s45_s18 }
  0x16   :  { %s614_s21 = scalar_lea.hbm %s867_s0, 64 }
  0x17   :  { %p615_p8 = scmp.ne.s32.totalorder %s867_s0, %s614_s21  ;;  %p618_p9 = scmp.lt.u32.totalorder %s614_s21, %s867_s0 }
  0x19   :  { %p620_p10 = pnand %p618_p9, %p615_p8 }
  0x1b   :  { %623 = shalt.err (!%p620_p10)
}
  0x1c   :  { %s624_s1 = scalar_lea.vmem %s23_s16, 64  ;;  %p629_p12 = scmp.lt.s32.totalorder %s23_s16, %s23_s16 }
  0x1d   :  { %p625_p11 = scmp.ne.s32.totalorder %s23_s16, %s624_s1  ;;  %p630_p13 = scmp.lt.s32.totalorder %s624_s1, %s624_s1 }
  0x1f   :  { %p631_p0 = por %p630_p13, %p629_p12 }
  0x21   :  { %p632_p1 = pnand %p631_p0, %p625_p11 }
  0x23   :  { %635 = shalt.err (!%p632_p1)
}
  0x24   :  { %25 = dma.hbm_to_vmem [thread:$0]  %s867_s0, 64, %s23_s16, [#allocation3]  }
  0x25   :  { %s636_s30 = scalar_lea.hbm %s870_s3, 1024 }
  0x26   :  { %p637_p2 = scmp.ne.s32.totalorder %s870_s3, %s636_s30  ;;  %p640_p3 = scmp.lt.u32.totalorder %s636_s30, %s870_s3 }
  0x28   :  { %p642_p4 = pnand %p640_p3, %p637_p2 }
  0x2a   :  { %645 = shalt.err (!%p642_p4)
}
  0x2b   :  { %s646_s14 = scalar_lea.vmem %s46_s18, 1024  ;;  %p651_p6 = scmp.lt.s32.totalorder %s46_s18, %s46_s18 }
  0x2c   :  { %p647_p5 = scmp.ne.s32.totalorder %s46_s18, %s646_s14  ;;  %p652_p7 = scmp.lt.s32.totalorder %s646_s14, %s646_s14 }
  0x2e   :  { %p653_p8 = por %p652_p7, %p651_p6 }
  0x30   :  { %p654_p9 = pnand %p653_p8, %p647_p5 }
  0x32   :  { %657 = shalt.err (!%p654_p9)
}
  0x33   :  { %51 = dma.hbm_to_vmem [thread:$0]  %s870_s3, 1024, %s46_s18, [#allocation6], %s711_s11, %s711_s11, %s712_s12  }
  0x34   :  { %s715_s16 = smov [#allocation8]   ;;  %s658_s21 = scalar_lea.hbm %s872_s5, 1024 }
  0x35   :  { %s59_s17 = sshll.u32 %s715_s16, 4  ;;  %p659_p10 = scmp.ne.s32.totalorder %s872_s5, %s658_s21  ;;  %s60_s17 = int_to_ptr.vmem [resolvable:$true] %s59_s17 }
  0x36   :  { %p662_p11 = scmp.lt.u32.totalorder %s658_s21, %s872_s5 }
  0x38   :  { %p664_p12 = pnand %p662_p11, %p659_p10 }
  0x3a   :  { %667 = shalt.err (!%p664_p12)
}
  0x3b   :  { %s668_s1 = scalar_lea.vmem %s60_s17, 1024  ;;  %p673_p0 = scmp.lt.s32.totalorder %s60_s17, %s60_s17 }
  0x3c   :  { %p669_p13 = scmp.ne.s32.totalorder %s60_s17, %s668_s1  ;;  %p674_p1 = scmp.lt.s32.totalorder %s668_s1, %s668_s1 }
  0x3e   :  { %p675_p2 = por %p674_p1, %p673_p0 }
  0x40   :  { %p676_p3 = pnand %p675_p2, %p669_p13 }
  0x42   :  { %679 = shalt.err (!%p676_p3)
}
  0x43   :  { %65 = dma.hbm_to_vmem [thread:$0]  %s872_s5, 1024, %s60_s17, [#allocation9], %s711_s11, %s711_s11, %s712_s12  }
  0x44   :  { %702 = dma.done.wait [#allocation3], 64  }
  0x45   :  { %703 = vsyncadd [#allocation3], 4294967232 }
  0x46   :  { %704 = dma.done.wait [#allocation6], 2048  }
  0x47   :  { %705 = vsyncadd [#allocation6], 4294965248 }
  0x48   :  { %706 = dma.done.wait [#allocation9], 1024  }
  0x49   :  { %707 = vsyncadd [#allocation9], 4294966272  ;;  %v716_v0 = vmov 0.0   ;;  %vm717_vm0 = vmmov 0   ;;  %v566_v1 = vld [vmem:[#allocation5] sm:$0xff]   ;;  %v567_v2 = vld [vmem:[#allocation5 + $0x8] sm:$0xff]   ;;  %v419_v49 = vlaneseq }
  0x4a   :  { %497 = vmatprep.subr.bf16.mxu0 %v716_v0  ;;  %513 = vmatprep.mubr.msk.bf16.mxu0 %vm717_vm0, %v716_v0  ;;  %v568_v3 = vld [vmem:[#allocation5 + $0x10] sm:$0xff]   ;;  %v574_v4 = vld [vmem:[#allocation7] sm:$0xff]   ;;  %v569_v5 = vld [vmem:[#allocation5 + $0x18] sm:$0xff]  }
  0x4b   :  { %517 = vmatprep.subr.bf16.mxu1 %v716_v0  ;;  %533 = vmatprep.mubr.msk.bf16.mxu1 %vm717_vm0, %v716_v0  ;;  %v575_v6 = vld [vmem:[#allocation7 + $0x8] sm:$0xff]   ;;  %v570_v7 = vld [vmem:[#allocation5 + $0x20] sm:$0xff]   ;;  %v576_v8 = vld [vmem:[#allocation7 + $0x10] sm:$0xff]   ;;  %v420_v50 = vand.u32 127, %v419_v49 }
  0x4c   :  { %498 = vmatpush3.bf16.msra.mxu0 %v566_v1  ;;  %518 = vmatpush3.bf16.msra.mxu1 %v574_v4  ;;  %v571_v9 = vld [vmem:[#allocation5 + $0x28] sm:$0xff]   ;;  %v577_v10 = vld [vmem:[#allocation7 + $0x18] sm:$0xff]   ;;  %v572_v11 = vld [vmem:[#allocation5 + $0x30] sm:$0xff]  }
  0x4d   :  { %499 = vmatprep.subr.bf16.mxu0 %v716_v0  ;;  %519 = vmatprep.subr.bf16.mxu1 %v716_v0  ;;  %v578_v12 = vld [vmem:[#allocation7 + $0x20] sm:$0xff]   ;;  %v573_v13 = vld [vmem:[#allocation5 + $0x38] sm:$0xff]   ;;  %v579_v14 = vld [vmem:[#allocation7 + $0x28] sm:$0xff]   ;;  %vm421_vm1 = vcmp.lt.s32.totalorder %v420_v50, 8 }
  0x4e   :  { %v81_v15 = vld [vmem:[#allocation2] sm:$0xf]  ;;  %v580_v16 = vld [vmem:[#allocation7 + $0x30] sm:$0xff]   ;;  %v582_v18 = vld [vmem:[#allocation8] sm:$0xff]  }
  0x4f   :  { %v581_v17 = vld [vmem:[#allocation7 + $0x38] sm:$0xff]   ;;  %v583_v19 = vld [vmem:[#allocation8 + $0x8] sm:$0xff]   ;;  %v584_v20 = vld [vmem:[#allocation8 + $0x10] sm:$0xff]  }
  0x50   :  { %500 = vmatpush3.bf16.msra.mxu0 %v567_v2  ;;  %520 = vmatpush3.bf16.msra.mxu1 %v575_v6  ;;  %v585_v21 = vld [vmem:[#allocation8 + $0x18] sm:$0xff]   ;;  %v586_v22 = vld [vmem:[#allocation8 + $0x20] sm:$0xff]   ;;  %v587_v23 = vld [vmem:[#allocation8 + $0x28] sm:$0xff]  }
  0x51   :  { %501 = vmatprep.subr.bf16.mxu0 %v716_v0  ;;  %521 = vmatprep.subr.bf16.mxu1 %v716_v0  ;;  %v443_v24 = vld [vmem:[%s869_s2] ss:$0 sm:$0xff]  ;;  %v588_v32 = vld [vmem:[#allocation8 + $0x30] sm:$0xff]  }
  0x52   :  { %v589_v33 = vld [vmem:[#allocation8 + $0x38] sm:$0xff]  }
  0x53   :  { %v452_v34 = vld [vmem:[%s871_s4] ss:$0 sm:$0xff]  ;;  %s718_s4 = smov [#allocation10]  }
  0x54   :  { %502 = vmatpush3.bf16.msra.mxu0 %v568_v3  ;;  %522 = vmatpush3.bf16.msra.mxu1 %v576_v8  ;;  %v461_v42 = vld [vmem:[%s873_s6] ss:$0 sm:$0xff]  ;;  %s432_s28 = sshll.u32 %s718_s4, 4  ;;  %s433_s28 = int_to_ptr.vmem [resolvable:$true] %s432_s28 }
  0x55   :  { %503 = vmatprep.subr.bf16.mxu0 %v716_v0  ;;  %523 = vmatprep.subr.bf16.mxu1 %v716_v0  ;;  %s680_s29 = scalar_lea.vmem %s433_s28, 128  ;;  %p685_p5 = scmp.lt.s32.totalorder %s433_s28, %s433_s28 }
  0x56   :  { %p681_p4 = scmp.ne.s32.totalorder %s433_s28, %s680_s29  ;;  %p686_p6 = scmp.lt.s32.totalorder %s680_s29, %s680_s29 }
  0x58   :  { %504 = vmatpush3.bf16.msra.mxu0 %v569_v5  ;;  %524 = vmatpush3.bf16.msra.mxu1 %v577_v10  ;;  %p687_p7 = por %p686_p6, %p685_p5 }
  0x59   :  { %505 = vmatprep.subr.bf16.mxu0 %v716_v0  ;;  %525 = vmatprep.subr.bf16.mxu1 %v716_v0 }
  0x5a   :  { %p688_p8 = pnand %p687_p7, %p681_p4 }
  0x5c   :  { %506 = vmatpush3.bf16.msra.mxu0 %v570_v7  ;;  %526 = vmatpush3.bf16.msra.mxu1 %v578_v12 }
  0x5d   :  { %507 = vmatprep.subr.bf16.mxu0 %v716_v0  ;;  %527 = vmatprep.subr.bf16.mxu1 %v716_v0 }
  0x60   :  { %508 = vmatpush3.bf16.msra.mxu0 %v571_v9  ;;  %528 = vmatpush3.bf16.msra.mxu1 %v579_v14 }
  0x61   :  { %509 = vmatprep.subr.bf16.mxu0 %v716_v0  ;;  %529 = vmatprep.subr.bf16.mxu1 %v716_v0 }
  0x64   :  { %510 = vmatpush3.bf16.msra.mxu0 %v572_v11  ;;  %530 = vmatpush3.bf16.msra.mxu1 %v580_v16 }
  0x65   :  { %511 = vmatprep.subr.bf16.mxu0 %v716_v0  ;;  %531 = vmatprep.subr.bf16.mxu1 %v716_v0 }
  0x68   :  { %512 = vmatpush3.bf16.msra.mxu0 %v573_v13  ;;  %532 = vmatpush3.bf16.msra.mxu1 %v581_v17 }
  0x69   :  { %537 = vmatprep.subr.bf16.mxu0 %v716_v0 }
  0x6b   :  { %514 = vmatmul.mubr.bf16.vlgmr.msra.gmra.mrb[0].mxu0 %v81_v15 }
  0x6c   :  { %553 = vmatprep.mubr.msk.bf16.mxu0 %vm717_vm0, %v716_v0  ;;  %538 = vmatpush3.bf16.msra.mxu0 %v582_v18 }
  0x6d   :  { %539 = vmatprep.subr.bf16.mxu0 %v716_v0 }
  0x70   :  { %540 = vmatpush3.bf16.msra.mxu0 %v583_v19 }
  0x71   :  { %541 = vmatprep.subr.bf16.mxu0 %v716_v0 }
  0x74   :  { %542 = vmatpush3.bf16.msra.mxu0 %v584_v20 }
  0x75   :  { %543 = vmatprep.subr.bf16.mxu0 %v716_v0 }
  0x78   :  { %544 = vmatpush3.bf16.msra.mxu0 %v585_v21 }
  0x79   :  { %545 = vmatprep.subr.bf16.mxu0 %v716_v0 }
  0x7c   :  { %546 = vmatpush3.bf16.msra.mxu0 %v586_v22 }
  0x7d   :  { %547 = vmatprep.subr.bf16.mxu0 %v716_v0 }
  0x80   :  { %548 = vmatpush3.bf16.msra.mxu0 %v587_v23 }
  0x81   :  { %549 = vmatprep.subr.bf16.mxu0 %v716_v0 }
  0x84   :  { %550 = vmatpush3.bf16.msra.mxu0 %v588_v32 }
  0x85   :  { %551 = vmatprep.subr.bf16.mxu0 %v716_v0 }
  0x88   :  { %552 = vmatpush3.bf16.msra.mxu0 %v589_v33 }
 0x13e   :  { %v187_v25 = vpop.f32.mrb[0].mxu0 }
 0x13f   :  { %v188_v26 = vadd.f32 %v443_v24, %v187_v25  ;;  %v515_v27 = vpop.f32.mrb[1].mxu0 }
 0x140   :  { %v190_v28 = vpop.f32.mrb[2].mxu0 }
 0x141   :  { %v193_v29 = vmax.f32 %v188_v26, 0.0  ;;  %v516_v30 = vpop.f32.mrb[3].mxu0 }
 0x143   :  { %v194_v31 = vpack.c.bf16 %v193_v29, %v193_v29 }
 0x145   :  { %534 = vmatmul.mubr.bf16.vlgmr.msra.gmra.mrb[0].mxu1 %v194_v31 }
 0x218   :  { %v300_v35 = vpop.f32.mrb[0].mxu1 }
 0x219   :  { %v301_v36 = vadd.f32 %v452_v34, %v300_v35  ;;  %v535_v37 = vpop.f32.mrb[1].mxu1 }
 0x21a   :  { %v303_v38 = vpop.f32.mrb[2].mxu1 }
 0x21b   :  { %v306_v39 = vmax.f32 %v301_v36, 0.0  ;;  %v536_v40 = vpop.f32.mrb[3].mxu1 }
 0x21d   :  { %v307_v41 = vpack.c.bf16 %v306_v39, %v306_v39 }
 0x21f   :  { %554 = vmatmul.mubr.bf16.vlgmr.msra.gmra.mrb[4].mxu0 %v307_v41 }
 0x2f2   :  { %v413_v43 = vpop.f32.mrb[4].mxu0 }
 0x2f3   :  { %v414_v44 = vadd.f32 %v461_v42, %v413_v43  ;;  %v555_v45 = vpop.f32.mrb[5].mxu0 }
 0x2f4   :  { %v416_v46 = vpop.f32.mrb[6].mxu0 }
 0x2f5   :  { %v422_v47 = vmul.f32 1.442695, %v414_v44  ;;  %v556_v48 = vpop.f32.mrb[7].mxu0 }
 0x2f7   :  { %590 = vpow2.f32 %v422_v47 }
 0x301   :  { %v591_v51 = vpop.eup %590 }
 0x302   :  { %v424_v52 = vsel %vm421_vm1, %v414_v44, %v591_v51 }
 0x303   :  { %425 = vst [vmem:[#allocation10] sm:$0xff] %v424_v52 }
 0x304   :  { %691 = shalt.err (!%p688_p8)
}
 0x305   :  { %s692_s8 = scalar_lea.hbm %s874_s7, 128 }
 0x306   :  { %p693_p9 = scmp.ne.s32.totalorder %s874_s7, %s692_s8  ;;  %p696_p10 = scmp.lt.u32.totalorder %s692_s8, %s874_s7 }
 0x308   :  { %p698_p11 = pnand %p696_p10, %p693_p9 }
 0x30a   :  { %701 = shalt.err (!%p698_p11)
}
 0x30b   :  { %435 = dma.vmem_to_hbm [thread:$0]  %s433_s28, 128, %s874_s7, [#allocation4]  }
 0x30c   :  { %708 = dma.done.wait [#allocation4], 128  }
 0x30d   :  { %709 = vsyncadd [#allocation4], 4294967168 }
 0x30e   :  { %439 = vsyncpa [#allocation3], 1 }
 0x30f   :  { %440 = vsyncpa [#allocation6], 1 }
 0x310   :  { %441 = vsyncpa [#allocation9], 1 }
 0x311   :  { %442 = vsyncpa [#allocation4], 1 }

</bundles_post_ra>
